<compile_context>
chip_gen: v7x
topology: tpu7x:2x2x1
jax: 0.10.0
libtpu: 0.0.40
codegen_flags: <defaults>
</compile_context>

<pallas_src>
import jax
import jax.numpy as jnp
from jax import lax
from jax.experimental import pallas as pl
from jax.experimental.pallas import tpu as pltpu

EPS = 1e-5  # nn.InstanceNorm1d default eps


def _residual_block_kernel(x_ref, w1_ref, w2_ref, w3_ref, alpha_ref, o_ref):
    # x_ref / o_ref : (Nb, C, L)
    # w*_ref        : (Cout, k*Cin) tap-major im2col weights (MXU dtype)
    # alpha_ref     : (1,) f32 in SMEM (PReLU slope)
    nb, c, L = x_ref.shape
    alpha = alpha_ref[0]

    # Lane index within each length-L row; hoisted once, reused by every tap mask.
    lane = lax.broadcasted_iota(jnp.int32, (nb, c, L), 2)

    def inorm_stats(v):
        # Single pass: mean and E[v^2] in one sweep; biased variance; eps inside rsqrt.
        mu = jnp.mean(v, axis=-1, keepdims=True)
        ex2 = jnp.mean(v * v, axis=-1, keepdims=True)
        rsig = lax.rsqrt(ex2 - mu * mu + EPS)
        return mu, rsig

    def inorm(v):
        mu, rsig = inorm_stats(v)
        return (v - mu) * rsig

    def prelu(v):
        return jnp.where(v >= 0, v, alpha * v)

    def shift_tap(v, s):
        # out[..., l] = v[..., l + s], zero where l + s falls outside [0, L).
        if s == 0:
            return v
        rolled = pltpu.roll(v, shift=(-s) % L, axis=2)
        mask = lane < (L - s) if s > 0 else lane >= (-s)
        return jnp.where(mask, rolled, 0.0)

    def conv1d_same(v, w_ref):
        # "same" conv (odd k) as a single im2col matmul per conv, batched over Nb:
        #   W' (Nb, Cout, k*Cin) @ stacked (Nb, k*Cin, L) -> (Nb, Cout, L), f32 accumulate.
        cout, kc = w_ref.shape
        cin = v.shape[1]
        k = kc // cin
        pad = k // 2
        parts = [shift_tap(v, dk - pad) for dk in range(k)]           # k taps, static unroll
        stacked = jnp.concatenate(parts, axis=1).astype(w_ref.dtype)  # (Nb, k*Cin, L)
        wb = jnp.broadcast_to(w_ref[...], (nb, cout, kc))             # (Nb, Cout, k*Cin)
        # Conv bias intentionally omitted: the following InstanceNorm cancels it exactly.
        return jnp.einsum("nok,nkl->nol", wb, stacked,
                          preferred_element_type=jnp.float32)         # (Nb, Cout, L) f32

    x = x_ref[...].astype(jnp.float32)
    # Residual = inorm(x): keep only the (Nb, C, 1) stats live across the conv stack and
    # rebuild (x - mu) * rsig from the VMEM-resident x block right before the add.
    mu_x, rsig_x = inorm_stats(x)

    out = prelu(inorm(conv1d_same(x, w1_ref)))
    out = prelu(inorm(conv1d_same(out, w2_ref)))
    out = inorm(conv1d_same(out, w3_ref))
    out = out + (x_ref[...].astype(jnp.float32) - mu_x) * rsig_x
    o_ref[...] = jnp.maximum(out, 0.0).astype(o_ref.dtype)


def residual_block_pallas(x, params, *, block_n=8, mxu_dtype=jnp.bfloat16):
    """x: (N, C, L) float32. params: {"conv1": (w, b), "conv2": ..., "conv3": ..., "alpha": scalar}.

    block_n: samples per grid step. For v7x size it against 64 MiB VMEM (roughly
    2*in + 2*out double buffers + ~3 live f32 intermediates, each Nb*C*L*4 bytes);
    v5e/v6e have 128 MiB. mxu_dtype=bf16 feeds the MXU at its native precision on
    v6e/v7x (accumulation stays f32); pass jnp.float32 for bit-accurate matmuls.
    For peak store bandwidth L should be a multiple of 128 (pad in the caller if ragged).
    """
    N, C, L = x.shape
    (w1, _b1), (w2, _b2), (w3, _b3) = params["conv1"], params["conv2"], params["conv3"]
    alpha = params["alpha"]

    # Largest divisor of N that is <= block_n ...
    bn = max(1, min(int(block_n), N))
    while N % bn:
        bn -= 1
    # ... and keep at least 2 grid steps so v7x's two TensorCores both get work.
    if N // bn < 2 and bn > 1:
        bn //= 2
        while N % bn:
            bn -= 1

    def prep_w(w):
        # (Cout, Cin, k) -> (Cout, k*Cin), tap-major, matching the in-kernel tap stacking.
        cout, cin, k = w.shape
        assert k % 2 == 1, "odd kernel sizes required (PyTorch padding = k // 2 keeps L)"
        return jnp.transpose(w, (0, 2, 1)).reshape(cout, k * cin).astype(mxu_dtype)

    w1p, w2p, w3p = prep_w(w1), prep_w(w2), prep_w(w3)
    alpha1 = jnp.reshape(alpha, (1,)).astype(jnp.float32)

    def full(shape):
        return pl.BlockSpec(shape, lambda n: (0,) * len(shape))

    grid_spec = pltpu.PrefetchScalarGridSpec(
        num_scalar_prefetch=0,
        grid=(N // bn,),
        in_specs=[
            pl.BlockSpec((bn, C, L), lambda n: (n, 0, 0)),              # x
            full(w1p.shape), full(w2p.shape), full(w3p.shape),          # im2col weights
            pl.BlockSpec(memory_space=pltpu.MemorySpace.SMEM),          # PReLU alpha
        ],
        out_specs=pl.BlockSpec((bn, C, L), lambda n: (n, 0, 0)),
    )

    return pl.pallas_call(
        _residual_block_kernel,
        out_shape=jax.ShapeDtypeStruct((N, C, L), jnp.float32),
        grid_spec=grid_spec,
        compiler_params=pltpu.CompilerParams(dimension_semantics=("parallel",)),
    )(x, w1p, w2p, w3p, alpha1)


# ---------------------------------------------------------------------------
# Pure-JAX reference (mirrors the PyTorch forward, biases included) for checking.
# ---------------------------------------------------------------------------
def _conv1d_ref(x, w, b):
    pad = w.shape[2] // 2
    out = lax.conv_general_dilated(
        x, w, window_strides=(1,), padding=[(pad, pad)],
        dimension_numbers=("NCH", "OIH", "NCH"))
    return out + b[None, :, None]


def _inorm_ref(x):
    mu = jnp.mean(x, axis=-1, keepdims=True)
    var = jnp.mean((x - mu) ** 2, axis=-1, keepdims=True)
    return (x - mu) / jnp.sqrt(var + EPS)


def residual_block_ref(x, params):
    (w1, b1), (w2, b2), (w3, b3) = params["conv1"], params["conv2"], params["conv3"]
    alpha = params["alpha"]
    prelu = lambda v: jnp.where(v >= 0, v, alpha * v)
    residual = _inorm_ref(x)
    out = prelu(_inorm_ref(_conv1d_ref(x, w1, b1)))
    out = prelu(_inorm_ref(_conv1d_ref(out, w2, b2)))
    out = _inorm_ref(_conv1d_ref(out, w3, b3))
    out = out + residual
    return jnp.maximum(out, 0.0)


if __name__ == "__main__":
    # Small shapes consistent with the module: the residual add requires
    # in_channels == out_channels, and odd kernel sizes keep the length unchanged.
    # L is kept a multiple of 128 so the output store is lane-dense.
    N, C, L = 8, 8, 128
    kernel_sizes = (3, 5, 3)

    key = jax.random.PRNGKey(0)
    keys = jax.random.split(key, 8)

    def init_conv(kw, kb, cin, cout, k):
        w = jax.random.normal(kw, (cout, cin, k), jnp.float32) * 0.1
        b = jax.random.normal(kb, (cout,), jnp.float32) * 0.1
        return w, b

    params = {
        "conv1": init_conv(keys[0], keys[1], C, C, kernel_sizes[0]),
        "conv2": init_conv(keys[2], keys[3], C, C, kernel_sizes[1]),
        "conv3": init_conv(keys[4], keys[5], C, C, kernel_sizes[2]),
        "alpha": jnp.float32(0.25),   # nn.PReLU() default init
    }

    x = jax.random.normal(keys[6], (N, C, L), jnp.float32)
    ref = residual_block_ref(x, params)

    # f32-MXU path: tight check against the reference.
    out_f32 = jax.block_until_ready(
        residual_block_pallas(x, params, block_n=8, mxu_dtype=jnp.float32))
    assert out_f32.shape == (N, C, L)
    assert jnp.allclose(out_f32, ref, atol=1e-3, rtol=1e-3), "f32 Pallas output mismatch"

    # bf16-MXU path (v6e/v7x default): matmul inputs in bf16, f32 accumulate -> looser check.
    out_bf16 = jax.block_until_ready(
        residual_block_pallas(x, params, block_n=8, mxu_dtype=jnp.bfloat16))
    assert jnp.allclose(out_bf16, ref, atol=1.5e-1, rtol=1.5e-1), "bf16 Pallas output mismatch"

    print("KERNEL_OK")
</pallas_src>

<mosaic_0001>
module attributes {stable_mosaic.version = 11 : i64} {
  func.func @_residual_block_kernel(%arg0: i32, %arg1: memref<4x8x128xf32, #tpu.memory_space<vmem>>, %arg2: memref<8x24xf32, #tpu.memory_space<vmem>>, %arg3: memref<8x40xf32, #tpu.memory_space<vmem>>, %arg4: memref<8x24xf32, #tpu.memory_space<vmem>>, %arg5: memref<1xf32, #tpu.memory_space<smem>>, %arg6: memref<4x8x128xf32, #tpu.memory_space<vmem>>) attributes {dimension_semantics = [#tpu.dimension_semantics<parallel>], iteration_bounds = array<i64: 2>, scalar_prefetch = 0 : i64, scratch_operands = 0 : i64, tpu.core_type = #tpu.core_type<tc>, window_params = [{transform_indices = @transform_0, window_bounds = array<i64: 4, 8, 128>}, {pipeline_mode = #tpu.pipeline_mode<synchronous>, transform_indices = @transform_1, window_bounds = array<i64: 8, 24>}, {pipeline_mode = #tpu.pipeline_mode<synchronous>, transform_indices = @transform_2, window_bounds = array<i64: 8, 40>}, {pipeline_mode = #tpu.pipeline_mode<synchronous>, transform_indices = @transform_3, window_bounds = array<i64: 8, 24>}, {transform_indices = @transform_4, window_bounds = array<i64: 1>}, {transform_indices = @transform_5, window_bounds = array<i64: 4, 8, 128>}]} {
    %c0 = arith.constant 0 : index
    %0 = memref.load %arg5[%c0] : memref<1xf32, #tpu.memory_space<smem>>
    %1 = tpu.iota {dimensions = array<i32: 2>} : vector<4x8x128xi32>
    %c0_0 = arith.constant 0 : index
    %c0_1 = arith.constant 0 : index
    %c0_2 = arith.constant 0 : index
    %2 = vector.load %arg1[%c0_0, %c0_1, %c0_2] : memref<4x8x128xf32, #tpu.memory_space<vmem>>, vector<4x8x128xf32>
    %cst = arith.constant dense<0.000000e+00> : vector<4x8xf32>
    %3 = vector.multi_reduction <add>, %2, %cst [2] : vector<4x8x128xf32> to vector<4x8xf32>
    %4 = vector.shape_cast %3 : vector<4x8xf32> to vector<4x8x1xf32>
    %cst_3 = arith.constant 1.280000e+02 : f32
    %5 = vector.broadcast %cst_3 : f32 to vector<4x8x1xf32>
    %6 = arith.divf %4, %5 : vector<4x8x1xf32>
    %7 = arith.mulf %2, %2 : vector<4x8x128xf32>
    %cst_4 = arith.constant dense<0.000000e+00> : vector<4x8xf32>
    %8 = vector.multi_reduction <add>, %7, %cst_4 [2] : vector<4x8x128xf32> to vector<4x8xf32>
    %9 = vector.shape_cast %8 : vector<4x8xf32> to vector<4x8x1xf32>
    %cst_5 = arith.constant 1.280000e+02 : f32
    %10 = vector.broadcast %cst_5 : f32 to vector<4x8x1xf32>
    %11 = arith.divf %9, %10 : vector<4x8x1xf32>
    %12 = arith.mulf %6, %6 : vector<4x8x1xf32>
    %13 = arith.subf %11, %12 : vector<4x8x1xf32>
    %cst_6 = arith.constant 9.99999974E-6 : f32
    %14 = vector.broadcast %cst_6 : f32 to vector<4x8x1xf32>
    %15 = arith.addf %13, %14 : vector<4x8x1xf32>
    %16 = math.rsqrt %15 : vector<4x8x1xf32>
    %c1_i32 = arith.constant 1 : i32
    %17 = tpu.dynamic_rotate %2 by %c1_i32 dim 2 : vector<4x8x128xf32>, i32 -> vector<4x8x128xf32>
    %c1_i32_7 = arith.constant 1 : i32
    %18 = vector.broadcast %c1_i32_7 : i32 to vector<4x8x128xi32>
    %19 = arith.cmpi sge, %1, %18 : vector<4x8x128xi32>
    %cst_8 = arith.constant 0.000000e+00 : f32
    %20 = vector.broadcast %cst_8 : f32 to vector<4x8x128xf32>
    %21 = arith.select %19, %17, %20 : vector<4x8x128xi1>, vector<4x8x128xf32>
    %c127_i32 = arith.constant 127 : i32
    %22 = tpu.dynamic_rotate %2 by %c127_i32 dim 2 : vector<4x8x128xf32>, i32 -> vector<4x8x128xf32>
    %c127_i32_9 = arith.constant 127 : i32
    %23 = vector.broadcast %c127_i32_9 : i32 to vector<4x8x128xi32>
    %24 = arith.cmpi slt, %1, %23 : vector<4x8x128xi32>
    %cst_10 = arith.constant 0.000000e+00 : f32
    %25 = vector.broadcast %cst_10 : f32 to vector<4x8x128xf32>
    %26 = arith.select %24, %22, %25 : vector<4x8x128xi1>, vector<4x8x128xf32>
    %27 = tpu.concatenate %21, %2, %26 in 1 : vector<4x8x128xf32>, vector<4x8x128xf32>, vector<4x8x128xf32> -> vector<4x24x128xf32>
    %c0_11 = arith.constant 0 : index
    %c0_12 = arith.constant 0 : index
    %28 = vector.load %arg2[%c0_11, %c0_12] : memref<8x24xf32, #tpu.memory_space<vmem>>, vector<8x24xf32>
    %29 = vector.shape_cast %28 : vector<8x24xf32> to vector<1x8x24xf32>
    %30 = vector.broadcast %29 : vector<1x8x24xf32> to vector<4x8x24xf32>
    "tpu.trace_start"() <{level = 10 : i32, message = "nok,nkl->nol"}> : () -> ()
    %cst_13 = arith.constant dense<0.000000e+00> : vector<4x8x128xf32>
    %31 = tpu.matmul %30, %27, %cst_13 {dimension_numbers = #tpu.dot_dimension_numbers<[2], [1], [1], [2], [0, 0, 0, 1, 1, 2], [0], [0]>} : vector<4x8x24xf32>, vector<4x24x128xf32>, vector<4x8x128xf32> -> vector<4x8x128xf32>
    "tpu.trace_stop"() : () -> ()
    %cst_14 = arith.constant dense<0.000000e+00> : vector<4x8xf32>
    %32 = vector.multi_reduction <add>, %31, %cst_14 [2] : vector<4x8x128xf32> to vector<4x8xf32>
    %33 = vector.shape_cast %32 : vector<4x8xf32> to vector<4x8x1xf32>
    %cst_15 = arith.constant 1.280000e+02 : f32
    %34 = vector.broadcast %cst_15 : f32 to vector<4x8x1xf32>
    %35 = arith.divf %33, %34 : vector<4x8x1xf32>
    %36 = arith.mulf %31, %31 : vector<4x8x128xf32>
    %cst_16 = arith.constant dense<0.000000e+00> : vector<4x8xf32>
    %37 = vector.multi_reduction <add>, %36, %cst_16 [2] : vector<4x8x128xf32> to vector<4x8xf32>
    %38 = vector.shape_cast %37 : vector<4x8xf32> to vector<4x8x1xf32>
    %cst_17 = arith.constant 1.280000e+02 : f32
    %39 = vector.broadcast %cst_17 : f32 to vector<4x8x1xf32>
    %40 = arith.divf %38, %39 : vector<4x8x1xf32>
    %41 = arith.mulf %35, %35 : vector<4x8x1xf32>
    %42 = arith.subf %40, %41 : vector<4x8x1xf32>
    %cst_18 = arith.constant 9.99999974E-6 : f32
    %43 = vector.broadcast %cst_18 : f32 to vector<4x8x1xf32>
    %44 = arith.addf %42, %43 : vector<4x8x1xf32>
    %45 = math.rsqrt %44 : vector<4x8x1xf32>
    %46 = vector.broadcast %35 : vector<4x8x1xf32> to vector<4x8x128xf32>
    %47 = arith.subf %31, %46 : vector<4x8x128xf32>
    %48 = vector.broadcast %45 : vector<4x8x1xf32> to vector<4x8x128xf32>
    %49 = arith.mulf %47, %48 : vector<4x8x128xf32>
    %cst_19 = arith.constant 0.000000e+00 : f32
    %50 = vector.broadcast %cst_19 : f32 to vector<4x8x128xf32>
    %51 = arith.cmpf oge, %49, %50 : vector<4x8x128xf32>
    %52 = vector.broadcast %0 : f32 to vector<4x8x128xf32>
    %53 = arith.mulf %52, %49 : vector<4x8x128xf32>
    %54 = arith.select %51, %49, %53 : vector<4x8x128xi1>, vector<4x8x128xf32>
    %c2_i32 = arith.constant 2 : i32
    %55 = tpu.dynamic_rotate %54 by %c2_i32 dim 2 : vector<4x8x128xf32>, i32 -> vector<4x8x128xf32>
    %c2_i32_20 = arith.constant 2 : i32
    %56 = vector.broadcast %c2_i32_20 : i32 to vector<4x8x128xi32>
    %57 = arith.cmpi sge, %1, %56 : vector<4x8x128xi32>
    %cst_21 = arith.constant 0.000000e+00 : f32
    %58 = vector.broadcast %cst_21 : f32 to vector<4x8x128xf32>
    %59 = arith.select %57, %55, %58 : vector<4x8x128xi1>, vector<4x8x128xf32>
    %c1_i32_22 = arith.constant 1 : i32
    %60 = tpu.dynamic_rotate %54 by %c1_i32_22 dim 2 : vector<4x8x128xf32>, i32 -> vector<4x8x128xf32>
    %c1_i32_23 = arith.constant 1 : i32
    %61 = vector.broadcast %c1_i32_23 : i32 to vector<4x8x128xi32>
    %62 = arith.cmpi sge, %1, %61 : vector<4x8x128xi32>
    %cst_24 = arith.constant 0.000000e+00 : f32
    %63 = vector.broadcast %cst_24 : f32 to vector<4x8x128xf32>
    %64 = arith.select %62, %60, %63 : vector<4x8x128xi1>, vector<4x8x128xf32>
    %c127_i32_25 = arith.constant 127 : i32
    %65 = tpu.dynamic_rotate %54 by %c127_i32_25 dim 2 : vector<4x8x128xf32>, i32 -> vector<4x8x128xf32>
    %c127_i32_26 = arith.constant 127 : i32
    %66 = vector.broadcast %c127_i32_26 : i32 to vector<4x8x128xi32>
    %67 = arith.cmpi slt, %1, %66 : vector<4x8x128xi32>
    %cst_27 = arith.constant 0.000000e+00 : f32
    %68 = vector.broadcast %cst_27 : f32 to vector<4x8x128xf32>
    %69 = arith.select %67, %65, %68 : vector<4x8x128xi1>, vector<4x8x128xf32>
    %c126_i32 = arith.constant 126 : i32
    %70 = tpu.dynamic_rotate %54 by %c126_i32 dim 2 : vector<4x8x128xf32>, i32 -> vector<4x8x128xf32>
    %c126_i32_28 = arith.constant 126 : i32
    %71 = vector.broadcast %c126_i32_28 : i32 to vector<4x8x128xi32>
    %72 = arith.cmpi slt, %1, %71 : vector<4x8x128xi32>
    %cst_29 = arith.constant 0.000000e+00 : f32
    %73 = vector.broadcast %cst_29 : f32 to vector<4x8x128xf32>
    %74 = arith.select %72, %70, %73 : vector<4x8x128xi1>, vector<4x8x128xf32>
    %75 = tpu.concatenate %59, %64, %54, %69, %74 in 1 : vector<4x8x128xf32>, vector<4x8x128xf32>, vector<4x8x128xf32>, vector<4x8x128xf32>, vector<4x8x128xf32> -> vector<4x40x128xf32>
    %c0_30 = arith.constant 0 : index
    %c0_31 = arith.constant 0 : index
    %76 = vector.load %arg3[%c0_30, %c0_31] : memref<8x40xf32, #tpu.memory_space<vmem>>, vector<8x40xf32>
    %77 = vector.shape_cast %76 : vector<8x40xf32> to vector<1x8x40xf32>
    %78 = vector.broadcast %77 : vector<1x8x40xf32> to vector<4x8x40xf32>
    "tpu.trace_start"() <{level = 10 : i32, message = "nok,nkl->nol"}> : () -> ()
    %cst_32 = arith.constant dense<0.000000e+00> : vector<4x8x128xf32>
    %79 = tpu.matmul %78, %75, %cst_32 {dimension_numbers = #tpu.dot_dimension_numbers<[2], [1], [1], [2], [0, 0, 0, 1, 1, 2], [0], [0]>} : vector<4x8x40xf32>, vector<4x40x128xf32>, vector<4x8x128xf32> -> vector<4x8x128xf32>
    "tpu.trace_stop"() : () -> ()
    %cst_33 = arith.constant dense<0.000000e+00> : vector<4x8xf32>
    %80 = vector.multi_reduction <add>, %79, %cst_33 [2] : vector<4x8x128xf32> to vector<4x8xf32>
    %81 = vector.shape_cast %80 : vector<4x8xf32> to vector<4x8x1xf32>
    %cst_34 = arith.constant 1.280000e+02 : f32
    %82 = vector.broadcast %cst_34 : f32 to vector<4x8x1xf32>
    %83 = arith.divf %81, %82 : vector<4x8x1xf32>
    %84 = arith.mulf %79, %79 : vector<4x8x128xf32>
    %cst_35 = arith.constant dense<0.000000e+00> : vector<4x8xf32>
    %85 = vector.multi_reduction <add>, %84, %cst_35 [2] : vector<4x8x128xf32> to vector<4x8xf32>
    %86 = vector.shape_cast %85 : vector<4x8xf32> to vector<4x8x1xf32>
    %cst_36 = arith.constant 1.280000e+02 : f32
    %87 = vector.broadcast %cst_36 : f32 to vector<4x8x1xf32>
    %88 = arith.divf %86, %87 : vector<4x8x1xf32>
    %89 = arith.mulf %83, %83 : vector<4x8x1xf32>
    %90 = arith.subf %88, %89 : vector<4x8x1xf32>
    %cst_37 = arith.constant 9.99999974E-6 : f32
    %91 = vector.broadcast %cst_37 : f32 to vector<4x8x1xf32>
    %92 = arith.addf %90, %91 : vector<4x8x1xf32>
    %93 = math.rsqrt %92 : vector<4x8x1xf32>
    %94 = vector.broadcast %83 : vector<4x8x1xf32> to vector<4x8x128xf32>
    %95 = arith.subf %79, %94 : vector<4x8x128xf32>
    %96 = vector.broadcast %93 : vector<4x8x1xf32> to vector<4x8x128xf32>
    %97 = arith.mulf %95, %96 : vector<4x8x128xf32>
    %cst_38 = arith.constant 0.000000e+00 : f32
    %98 = vector.broadcast %cst_38 : f32 to vector<4x8x128xf32>
    %99 = arith.cmpf oge, %97, %98 : vector<4x8x128xf32>
    %100 = vector.broadcast %0 : f32 to vector<4x8x128xf32>
    %101 = arith.mulf %100, %97 : vector<4x8x128xf32>
    %102 = arith.select %99, %97, %101 : vector<4x8x128xi1>, vector<4x8x128xf32>
    %c1_i32_39 = arith.constant 1 : i32
    %103 = tpu.dynamic_rotate %102 by %c1_i32_39 dim 2 : vector<4x8x128xf32>, i32 -> vector<4x8x128xf32>
    %c1_i32_40 = arith.constant 1 : i32
    %104 = vector.broadcast %c1_i32_40 : i32 to vector<4x8x128xi32>
    %105 = arith.cmpi sge, %1, %104 : vector<4x8x128xi32>
    %cst_41 = arith.constant 0.000000e+00 : f32
    %106 = vector.broadcast %cst_41 : f32 to vector<4x8x128xf32>
    %107 = arith.select %105, %103, %106 : vector<4x8x128xi1>, vector<4x8x128xf32>
    %c127_i32_42 = arith.constant 127 : i32
    %108 = tpu.dynamic_rotate %102 by %c127_i32_42 dim 2 : vector<4x8x128xf32>, i32 -> vector<4x8x128xf32>
    %c127_i32_43 = arith.constant 127 : i32
    %109 = vector.broadcast %c127_i32_43 : i32 to vector<4x8x128xi32>
    %110 = arith.cmpi slt, %1, %109 : vector<4x8x128xi32>
    %cst_44 = arith.constant 0.000000e+00 : f32
    %111 = vector.broadcast %cst_44 : f32 to vector<4x8x128xf32>
    %112 = arith.select %110, %108, %111 : vector<4x8x128xi1>, vector<4x8x128xf32>
    %113 = tpu.concatenate %107, %102, %112 in 1 : vector<4x8x128xf32>, vector<4x8x128xf32>, vector<4x8x128xf32> -> vector<4x24x128xf32>
    %c0_45 = arith.constant 0 : index
    %c0_46 = arith.constant 0 : index
    %114 = vector.load %arg4[%c0_45, %c0_46] : memref<8x24xf32, #tpu.memory_space<vmem>>, vector<8x24xf32>
    %115 = vector.shape_cast %114 : vector<8x24xf32> to vector<1x8x24xf32>
    %116 = vector.broadcast %115 : vector<1x8x24xf32> to vector<4x8x24xf32>
    "tpu.trace_start"() <{level = 10 : i32, message = "nok,nkl->nol"}> : () -> ()
    %cst_47 = arith.constant dense<0.000000e+00> : vector<4x8x128xf32>
    %117 = tpu.matmul %116, %113, %cst_47 {dimension_numbers = #tpu.dot_dimension_numbers<[2], [1], [1], [2], [0, 0, 0, 1, 1, 2], [0], [0]>} : vector<4x8x24xf32>, vector<4x24x128xf32>, vector<4x8x128xf32> -> vector<4x8x128xf32>
    "tpu.trace_stop"() : () -> ()
    %cst_48 = arith.constant dense<0.000000e+00> : vector<4x8xf32>
    %118 = vector.multi_reduction <add>, %117, %cst_48 [2] : vector<4x8x128xf32> to vector<4x8xf32>
    %119 = vector.shape_cast %118 : vector<4x8xf32> to vector<4x8x1xf32>
    %cst_49 = arith.constant 1.280000e+02 : f32
    %120 = vector.broadcast %cst_49 : f32 to vector<4x8x1xf32>
    %121 = arith.divf %119, %120 : vector<4x8x1xf32>
    %122 = arith.mulf %117, %117 : vector<4x8x128xf32>
    %cst_50 = arith.constant dense<0.000000e+00> : vector<4x8xf32>
    %123 = vector.multi_reduction <add>, %122, %cst_50 [2] : vector<4x8x128xf32> to vector<4x8xf32>
    %124 = vector.shape_cast %123 : vector<4x8xf32> to vector<4x8x1xf32>
    %cst_51 = arith.constant 1.280000e+02 : f32
    %125 = vector.broadcast %cst_51 : f32 to vector<4x8x1xf32>
    %126 = arith.divf %124, %125 : vector<4x8x1xf32>
    %127 = arith.mulf %121, %121 : vector<4x8x1xf32>
    %128 = arith.subf %126, %127 : vector<4x8x1xf32>
    %cst_52 = arith.constant 9.99999974E-6 : f32
    %129 = vector.broadcast %cst_52 : f32 to vector<4x8x1xf32>
    %130 = arith.addf %128, %129 : vector<4x8x1xf32>
    %131 = math.rsqrt %130 : vector<4x8x1xf32>
    %132 = vector.broadcast %121 : vector<4x8x1xf32> to vector<4x8x128xf32>
    %133 = arith.subf %117, %132 : vector<4x8x128xf32>
    %134 = vector.broadcast %131 : vector<4x8x1xf32> to vector<4x8x128xf32>
    %135 = arith.mulf %133, %134 : vector<4x8x128xf32>
    %c0_53 = arith.constant 0 : index
    %c0_54 = arith.constant 0 : index
    %c0_55 = arith.constant 0 : index
    %136 = vector.load %arg1[%c0_53, %c0_54, %c0_55] : memref<4x8x128xf32, #tpu.memory_space<vmem>>, vector<4x8x128xf32>
    %137 = vector.broadcast %6 : vector<4x8x1xf32> to vector<4x8x128xf32>
    %138 = arith.subf %136, %137 : vector<4x8x128xf32>
    %139 = vector.broadcast %16 : vector<4x8x1xf32> to vector<4x8x128xf32>
    %140 = arith.mulf %138, %139 : vector<4x8x128xf32>
    %141 = arith.addf %135, %140 : vector<4x8x128xf32>
    %cst_56 = arith.constant 0.000000e+00 : f32
    %142 = vector.broadcast %cst_56 : f32 to vector<4x8x128xf32>
    %143 = arith.maximumf %141, %142 : vector<4x8x128xf32>
    %c0_57 = arith.constant 0 : index
    %c0_58 = arith.constant 0 : index
    %c0_59 = arith.constant 0 : index
    %144 = vector.load %arg6[%c0_57, %c0_58, %c0_59] : memref<4x8x128xf32, #tpu.memory_space<vmem>>, vector<4x8x128xf32>
    tpu.vector_store %arg6[%c0_57, %c0_58, %c0_59], %143 {strides = array<i32>} : memref<4x8x128xf32, #tpu.memory_space<vmem>>, vector<4x8x128xf32>,
    return
  }
  func.func @transform_0(%arg0: i32) -> (i32, i32, i32) {
    %c0_i32 = arith.constant 0 : i32
    %c0_i32_0 = arith.constant 0 : i32
    %c0_i32_1 = arith.constant 0 : i32
    return %arg0, %c0_i32, %c0_i32_0 : i32, i32, i32
  }
  func.func @transform_1(%arg0: i32) -> (i32, i32) {
    %c0_i32 = arith.constant 0 : i32
    %c0_i32_0 = arith.constant 0 : i32
    %c0_i32_1 = arith.constant 0 : i32
    return %c0_i32, %c0_i32_0 : i32, i32
  }
  func.func @transform_2(%arg0: i32) -> (i32, i32) {
    %c0_i32 = arith.constant 0 : i32
    %c0_i32_0 = arith.constant 0 : i32
    %c0_i32_1 = arith.constant 0 : i32
    return %c0_i32, %c0_i32_0 : i32, i32
  }
  func.func @transform_3(%arg0: i32) -> (i32, i32) {
    %c0_i32 = arith.constant 0 : i32
    %c0_i32_0 = arith.constant 0 : i32
    %c0_i32_1 = arith.constant 0 : i32
    return %c0_i32, %c0_i32_0 : i32, i32
  }
  func.func @transform_4(%arg0: i32) -> i32 {
    %c0_i32 = arith.constant 0 : i32
    %c0_i32_0 = arith.constant 0 : i32
    return %c0_i32 : i32
  }
  func.func @transform_5(%arg0: i32) -> (i32, i32, i32) {
    %c0_i32 = arith.constant 0 : i32
    %c0_i32_0 = arith.constant 0 : i32
    %c0_i32_1 = arith.constant 0 : i32
    return %arg0, %c0_i32, %c0_i32_0 : i32, i32, i32
  }
}

</mosaic_0001>

<bundles_post_ra>
// kernel: tpu_custom_call.1
= control target key start
LH: loop header
LB: loop body
LE: loop exit
PB: predicated region body
PF: predicated region fallthrough
CT: control target
= control target key end

     0   :  { %s2765_s0 = inlined_call_operand.hbm [shape: f32[8,8,128], index: 0, kind: input, shape index: {}]   ;;  %s2766_s1 = inlined_call_operand.hbm [shape: f32[8,24], index: 1, kind: input, shape index: {}]   ;;  %s2767_s2 = inlined_call_operand.vmem [shape: f32[8,40], index: 2, kind: input, shape index: {}]   ;;  %s2768_s3 = inlined_call_operand.hbm [shape: f32[8,24], index: 3, kind: input, shape index: {}]   ;;  %s2769_s4 = inlined_call_operand.<no memory space> [shape: f32[1], index: 4, kind: input, shape index: {}]   ;;  %s2770_s5 = inlined_call_operand.hbm [shape: f32[8,8,128], index: 5, kind: output, shape index: {}]  }
   0x1   :  { %10 = sst [smem:[#allocation2]] %s2769_s4 }
   0x2   :  { %11 = vsyncpa [#allocation4], 0 }
   0x3   :  { %13 = vsyncpa [#allocation4 + $0x1], 0 }
   0x4   :  { %14 = vsyncpa [#allocation7], 0 }
   0x5   :  { %15 = vsyncpa [#allocation5], 0 }
   0x6   :  { %17 = vsyncpa [#allocation5 + $0x1], 0  ;;  %s2264_s20 = smov 0   ;;  %s2266_s21 = smov 0  }
   0x7   :  { %s2268_s22 = smov 0   ;;  %s2270_s23 = smov 0  }
   0x8 LB: > { %s2285_s4 = sadd.s32 4294967295, %s2213_s23   ;;  %s1588_s24 = sadd.s32 4294967294, %s2213_s23   ;;  %s2213_s23 = sphi %s2270_s23, %s2801_s23   ;;  %s2209_s22 = sphi %s2268_s22, %s2800_s22   ;;  %s2205_s21 = sphi %s2266_s21, %s2799_s21   ;;  %s2201_s20 = sphi %s2264_s20, %s2798_s20  }
   0x9   : > { %s2289_s25 = sadd.s32 1, %s2213_s23   ;;  %s30_s26 = sadd.s32 1, %s2209_s22 }
   0xa   : > { %s27_s27 = ssub.s32 %s2213_s23, %s2289_s25  ;;  %p37_p0 = scmp.ne.s32.totalorder %s2209_s22, %s2205_s21 }
   0xb   : > { %p28_p1 = scmp.eq.s32.totalorder %s27_s27, 0  ;;  %p38_p2 = scmp.eq.s32.totalorder %s2213_s23, 0 }
   0xc   : > { %p43_p3 = scmp.ne.s32.totalorder %s2205_s21, %s2201_s20  ;;  %p2771_p4 = scmp.eq.s32.totalorder %s2285_s4, 0 }
   0xd   : > { %s2301_s28 = scalar_select %p28_p1, %s2209_s22, %s30_s26  }
   0xe   : > { %p2303_p5 = por %p38_p2, %p37_p0  ;;  %p2309_p6 = por %p2771_p4, %p43_p3 }
   0xf   : > { %p151_p7 = scmp.eq.s32.totalorder %s2285_s4, 1  ;;  %p157_p8 = scmp.eq.s32.totalorder %s1588_s24, 1 }
  0x10   : > { %s2777_s30 = scalar_select %p2309_p6, 1, 0 }
  0x11   : > { %p1589_p9 = scmp.ge.s32.totalorder %s2213_s23, 1  ;;  %p164_p10 = scmp.lt.s32.totalorder %s2213_s23, 3 }
  0x12   : > { %p2316_p11 = por %p151_p7, %p37_p0  ;;  %p2320_p12 = por %p157_p8, %p43_p3 }
  0x13   : > { %p2324_p13 = pnand %p1589_p9, %p164_p10  ;;  %s2215_s9 = smov [#allocation6]  }
  0x14   : > { %s2778_s6 = scalar_select %p2316_p11, 1, 0 }
  0x15   : > { %s2779_s7 = scalar_select %p2320_p12, 1, 0 }
  0x16   : > { %s2780_s8 = scalar_select %p2324_p13, 1, 0 }
  0x17   : > { %p1908_p2 = pneg %p2324_p13  ;;  %s177_s10 = sshll.u32 %s2215_s9, 4  ;;  %s178_s10 = int_to_ptr.vmem [resolvable:$true] %s177_s10 }
  0x18   : > { %p1925_p4 = scmp.lt.s32.totalorder %s2213_s23, 2  ;;  %p2781_p0 = scmp.eq.s32.totalorder %s2285_s4, 0 }
  0x19   : > { %s2216_s13 = smov [#allocation8]   ;;  %s2057_s17 = scalar_lea.hbm %s2766_s1, 128 }
  0x1a   : > { %p2334_p7 = pnand %p1908_p2, %p2781_p0  ;;  %p2340_p3 = pnand %p1925_p4, %p2303_p5 }
  0x1b   : > { %s191_s14 = sshll.u32 %s2216_s13, 4  ;;  %p2058_p8 = scmp.ne.s32.totalorder %s2766_s1, %s2057_s17  ;;  %s2344_s14 = int_to_ptr.vmem [resolvable:$true] %s191_s14 }
  0x1c   : > { %s2783_s12 = scalar_select %p2340_p3, 1, 0 }
  0x1d   : > { %p2059_p9 = pneg %p2334_p7  ;;  %p2064_p10 = scmp.lt.u32.totalorder %s2057_s17, %s2766_s1 }
  0x1f   : > { %p2060_p4 = pnand %p2059_p9, %p2058_p8 }
  0x21   : > { %p2061_p5 = pneg %p2060_p4 }
  0x23   : > { %p2066_p2 = pnand %p2064_p10, %p2061_p5 }
  0x25   : > { %2069 = shalt.err (!%p2066_p2)
}
  0x26   : > { %s2070_s27 = scalar_lea.vmem %s178_s10, 128  ;;  %p2078_p11 = scmp.lt.s32.totalorder %s178_s10, %s178_s10 }
  0x27   : > { %p2071_p0 = scmp.ne.s32.totalorder %s178_s10, %s2070_s27  ;;  %p2079_p6 = scmp.lt.s32.totalorder %s2070_s27, %s2070_s27 }
  0x29   : > { %p2073_p1 = pnand %p2071_p0, %p2059_p9  ;;  %p2080_p13 = por %p2079_p6, %p2078_p11 }
  0x2b   : > { %p2074_p12 = pneg %p2073_p1 }
  0x2d   : > { %p2081_p3 = pnand %p2080_p13, %p2074_p12 }
  0x2f   : > { %2084 = shalt.err (!%p2081_p3)
}
  0x30   : > { %1911 = dma.hbm_to_vmem [thread:$0]  (!%p2334_p7), %s2766_s1, 128, %s178_s10, [#allocation7]  }
  0x31   : > { %s205_s13 = sand.u32 1, %s2209_s22   ;;  %s2085_s17 = scalar_lea.hbm %s2768_s3, 128 }
  0x32   : > { %p2086_p1 = scmp.ne.s32.totalorder %s2768_s3, %s2085_s17  ;;  %p2092_p12 = scmp.lt.u32.totalorder %s2085_s17, %s2768_s3 }
  0x34   : > { %p2088_p6 = pnand %p2086_p1, %p2059_p9 }
  0x36   : > { %p2089_p11 = pneg %p2088_p6 }
  0x38   : > { %p2094_p13 = pnand %p2092_p12, %p2089_p11 }
  0x3a   : > { %2097 = shalt.err (!%p2094_p13)
}
  0x3b   : > { %s2098_s10 = scalar_lea.vmem %s2344_s14, 128  ;;  %p2106_p5 = scmp.lt.s32.totalorder %s2344_s14, %s2344_s14 }
  0x3c   : > { %p2099_p3 = scmp.ne.s32.totalorder %s2344_s14, %s2098_s10  ;;  %p2107_p10 = scmp.lt.s32.totalorder %s2098_s10, %s2098_s10 }
  0x3e   : > { %p2101_p8 = pnand %p2099_p3, %p2059_p9  ;;  %p2108_p2 = por %p2107_p10, %p2106_p5 }
  0x40   : > { %p2102_p4 = pneg %p2101_p8 }
  0x42   : > { %p2109_p0 = pnand %p2108_p2, %p2102_p4 }
  0x44   : > { %2112 = shalt.err (!%p2109_p0)
}
  0x45   : > { %1914 = dma.hbm_to_vmem [thread:$0]  (!%p2334_p7), %s2768_s3, 128, %s2344_s14, [#allocation7]  }
  0x46   : > { %s1593_s9 = sshll.u32 %s205_s13, 5  ;;  %s1650_s15 = sshll.u32 %s2213_s23, 9 }
  0x47   : > { %s2398_s18 = scalar_lea.hbm %s2765_s0, %s1650_s15  ;;  %s209_s11 = scalar_lea.vmem [#allocation3], %s1593_s9 }
  0x48   : > { %s216_s19 = sshll.u32 %s209_s11, 4  ;;  %s2402_s24 = scalar_lea.sflag [#allocation4], %s205_s13  ;;  %s2400_s19 = int_to_ptr.vmem [resolvable:$true] %s216_s19 }
  0x49   : > { %s2113_s26 = scalar_lea.hbm %s2398_s18, 512  ;;  %p2784_p7 = scmp.ne.s32.totalorder %s2783_s12, 0 }
  0x4a   : > { %p2114_p9 = scmp.ne.s32.totalorder %s2398_s18, %s2113_s26  ;;  %s2118_s27 = scalar_lea.hbm %s2765_s0, 1024 }
  0x4b   : > { %p2115_p1 = pneg %p2784_p7  ;;  %p2119_p12 = scmp.lt.u32.totalorder %s2398_s18, %s2765_s0 }
  0x4c   : > { %p2120_p13 = scmp.lt.u32.totalorder %s2118_s27, %s2113_s26  ;;  %p2122_p8 = scmp.lt.u32.totalorder %s2113_s26, %s2398_s18 }
  0x4d   : > { %p2116_p6 = pnand %p2115_p1, %p2114_p9 }
  0x4e   : > { %p2121_p3 = por %p2120_p13, %p2119_p12 }
  0x4f   : > { %p2117_p11 = pneg %p2116_p6 }
  0x50   : > { %p2123_p4 = por %p2122_p8, %p2121_p3 }
  0x52   : > { %p2124_p5 = pnand %p2123_p4, %p2117_p11 }
  0x54   : > { %2127 = shalt.err (!%p2124_p5)
}
  0x55   : > { %s2128_s13 = scalar_lea.vmem %s2400_s19, 512  ;;  %s2217_s9 = smov [#allocation3]  }
  0x56   : > { %p2129_p10 = scmp.ne.s32.totalorder %s2400_s19, %s2128_s13  ;;  %s2133_s16 = sshll.u32 %s2217_s9, 4  ;;  %s2134_s16 = int_to_ptr.vmem [resolvable:$false] %s2133_s16 }
  0x57   : > { %s2135_s17 = scalar_lea.vmem %s2134_s16, 1024  ;;  %p2136_p9 = scmp.lt.s32.totalorder %s2400_s19, %s2134_s16 }
  0x58   : > { %p2131_p2 = pnand %p2129_p10, %p2115_p1  ;;  %p2137_p6 = scmp.lt.s32.totalorder %s2135_s17, %s2128_s13 }
  0x5a   : > { %p2132_p0 = pneg %p2131_p2  ;;  %p2138_p12 = por %p2137_p6, %p2136_p9 }
  0x5c   : > { %p2139_p13 = pnand %p2138_p12, %p2132_p0 }
  0x5e   : > { %2142 = shalt.err (!%p2139_p13)
}
  0x5f   : > { %s2218_s11 = smov 128   ;;  %s2219_s26 = smov 8  }
  0x60   : > { %1918 = dma.hbm_to_vmem [thread:$0]  (!%p2784_p7), %s2398_s18, 512, %s2400_s19, %s2402_s24, %s2218_s11, %s2218_s11, %s2219_s26  }
  0x61   : > { %p2785_p1 = scmp.ne.s32.totalorder %s2780_s8, 0 }
  0x62   : > { %s2433_s14 = sand.u32 (!%p2785_p1), 1, %s2205_s21   ;;  %p2786_p11 = scmp.ne.s32.totalorder (!%p2785_p1), %s2777_s30, 0 }
  0x63   : > { %228 = sbr.rel (%p2785_p1) target bundleno = 1667 (0x683), region = 40  ;;  %s1597_s10 = sshll.u32 (!%p2785_p1), %s2433_s14, 5 }
  0x64   : > { %s231_s27 = scalar_lea.sflag (!%p2785_p1), [#allocation4], %s2433_s14  ;;  %s234_s29 = scalar_lea.vmem (!%p2785_p1), [#allocation3], %s1597_s10 }
  0x6a   : > { %2188 = dma.done.wait (%p2786_p11), %s231_s27, 512  }
  0x6b   : > { %2190 = vsyncadd (%p2786_p11), %s231_s27, 4294966784  ;;  %p2787_p7 = scmp.eq.s32.totalorder %s2285_s4, 0 }
  0x6d   : > { %2192 = dma.done.wait (%p2787_p7), [#allocation7], 256   ;;  %p2788_p3 = pmov %p2787_p7 }
  0x6e   : > { %v2220_v0 = vmov 0.0|0.0   ;;  %vm2221_vm0 = vmmov 0   ;;  %v2222_v1 = vmov 0.0   ;;  %v2453_v2 = vld [vmem:[%s234_s29] sm:$0xff]  ;;  %v2455_v3 = vld [vmem:[%s234_s29 + $0x8] sm:$0xff]  ;;  %v2457_v4 = vld [vmem:[%s234_s29 + $0x10] sm:$0xff]  ;;  %v272_v8 = vlaneseq }
  0x6f   : > { %2194 = vsyncadd (%p2788_p3), [#allocation7], 4294967040  ;;  %1832 = vmatprep.subr.bf16.mxu0 %v2220_v0  ;;  %1836 = vmatprep.subr.bf16.mxu1 %v2220_v0  ;;  %v1975_v5 = vpack.i.bf16 %v2455_v3, %v2453_v2  ;;  %s2223_s30 = smov 127   ;;  %v2463_v6 = vld [vmem:[%s234_s29 + $0x18] sm:$0xff]  ;;  %s2224_s8 = smov 1   ;;  %vm2225_vm2 = vmmov 1  }
  0x70   : > { %1714 = vmatprep.mubr.msk.f32.mxu0 %vm2221_vm0, %v2222_v1  ;;  %1723 = vmatprep.mubr.msk.f32.mxu1 %vm2221_vm0, %v2222_v1  ;;  %v1980_v7 = vpack.i.bf16 %v2463_v6, %v2457_v4  ;;  %v2475_v9 = vand.u32 127, %v272_v8  ;;  %v349_v21 = vld [vmem:[#allocation6] sm:$0xff]  ;;  %vm350_vm5 = vcmask 195584   ;;  %s271_s12 = sld [smem:[#allocation2]]  ;;  %s2226_s18 = smov 2   ;;  %vm750_vm14 = vcmask 326656  }
  0x71   : > { %338 = vrot.lane.b32.xlu1 %v2455_v3, %s2223_s30  ;;  %1976 = vrot.lane.b32.xlu0 %v1975_v5, %s2224_s8  ;;  %s2227_s19 = smov 126   ;;  %s268_s13 = scalar_lea.vmem [#allocation9], %s1597_s10 }
  0x72   : > { %vm331_vm1 = vcmp.ge.s32.totalorder %v2475_v9, 1  ;;  %vm344_vm4 = vcmp.lt.s32.totalorder %v2475_v9, 127  ;;  %vm707_vm10 = vcmp.ge.s32.totalorder %v2475_v9, 2  ;;  %vm744_vm13 = vcmp.lt.s32.totalorder %v2475_v9, 126  ;;  %s1651_s9 = sshll.u32 %s2285_s4, 9  ;;  %s1496_s16 = sshll.u32 %s268_s13, 4  ;;  %s2721_s16 = int_to_ptr.vmem [resolvable:$true] %s1496_s16 }
  0x73   : > { %vm2481_vm3 = vmpackc.low %vm2225_vm2, %vm331_vm1  ;;  %s2719_s26 = scalar_lea.hbm %s2770_s5, %s1651_s9  ;;  %s1483_s10 = scalar_lea.sflag [#allocation5], %s2433_s14 }
  0x74   : > { %vm2549_vm11 = vmpackc.low %vm331_vm1, %vm707_vm10  ;;  %s2143_s27 = scalar_lea.vmem %s2721_s16, 512  ;;  %p2795_p4 = scmp.ne.s32.totalorder %s2778_s6, 0 }
  0x75   : > { %1981 = vrot.lane.b32.xlu1 %v1980_v7, %s2224_s8  ;;  %336 = vrot.lane.b32.xlu0 %v2453_v2, %s2223_s30  ;;  %vm2562_vm12 = vmpackc.low %vm344_vm4, %vm2225_vm2  ;;  %p2144_p8 = scmp.ne.s32.totalorder %s2721_s16, %s2143_s27  ;;  %s2228_s4 = smov [#allocation9]  }
  0x76   : > { %s2147_s29 = sshll.u32 %s2228_s4, 4  ;;  %s2148_s29 = int_to_ptr.vmem [resolvable:$false] %s2147_s29 }
  0x77   : > { %p2145_p5 = pnand %p2144_p8, %p2795_p4  ;;  %p2150_p2 = scmp.lt.s32.totalorder %s2721_s16, %s2148_s29 }
  0x79   : > { %342 = vrot.lane.b32.xlu1 %v2463_v6, %s2223_s30  ;;  %340 = vrot.lane.b32.xlu0 %v2457_v4, %s2223_s30  ;;  %p2146_p10 = pneg %p2145_p5 }
  0xe3   : > { %v339_v10 = vpop.permute.xlu1 %338  ;;  %v1977_v11 = vpop.permute.xlu0 %1976 }
  0xe4   : > { %v1979_v12 = vunpack.i.h.bf16 %v1977_v11  ;;  %v1978_v13 = vunpack.i.l.bf16 %v1977_v11 }
  0xe6   : > { %v1837_v16 = vpack.c.bf16 %v2455_v3, %v1979_v12  ;;  %v1833_v17 = vpack.c.bf16 %v2453_v2, %v1978_v13  ;;  %v2531_v12 = vstv %s271_s12 }
  0xe7   : > { %v1982_v15 = vpop.permute.xlu1 %1981  ;;  %v337_v20 = vpop.permute.xlu0 %336 }
  0xe8   : > { %v1983_v18 = vunpack.i.l.bf16 %v1982_v15  ;;  %1835 = vmatpush3.bf16.msk.msra.mxu0 %vm2481_vm3, %v1833_v17  ;;  %1839 = vmatpush3.bf16.msk.msra.mxu1 %vm2481_vm3, %v1837_v16  ;;  %v1984_v19 = vunpack.i.h.bf16 %v1982_v15 }
  0xe9   : > { %1712 = vmatprep.subr.mxu0 %v2222_v1  ;;  %1721 = vmatprep.subr.mxu1 %v2222_v1 }
  0xea   : > { %v1841_v22 = vpack.c.bf16 %v2457_v4, %v1983_v18  ;;  %v1845_v23 = vpack.c.bf16 %v2463_v6, %v1984_v19 }
  0xeb   : > { %v341_v24 = vpop.permute.xlu0 %340  ;;  %v343_v25 = vpop.permute.xlu1 %342 }
  0xec   : > { %1713 = vmatpush3.msk.msra.mxu0 %vm344_vm4, %v337_v20  ;;  %1722 = vmatpush3.msk.msra.mxu1 %vm344_vm4, %v339_v10 }
  0xed   : > { %1715 = vmatmul.mubr.msk.f32.vlgmr.msra.gmra.mrb[0].mxu0 %vm350_vm5, %v349_v21  ;;  %1724 = vmatmul.mubr.msk.f32.vlgmr.msra.gmra.mrb[0].mxu1 %vm350_vm5, %v349_v21 }
  0xee   : > { %1840 = vmatprep.subr.bf16.mxu0 %v2220_v0  ;;  %1732 = vmatprep.mubr.msk.f32.mxu0 %vm2221_vm0, %v2222_v1 }
  0xef   : > { %1843 = vmatpush3.bf16.msk.msra.mxu0 %vm2481_vm3, %v1841_v22  ;;  %1844 = vmatprep.subr.bf16.mxu1 %v2220_v0 }
  0xf0   : > { %1730 = vmatprep.subr.mxu0 %v2222_v1  ;;  %1847 = vmatpush3.bf16.msk.msra.mxu1 %vm2481_vm3, %v1845_v23 }
  0xf1   : > { %1739 = vmatprep.subr.mxu1 %v2222_v1  ;;  %1741 = vmatprep.mubr.msk.f32.mxu1 %vm2221_vm0, %v2222_v1 }
  0xf3   : > { %1731 = vmatpush3.msk.msra.mxu0 %vm344_vm4, %v341_v24 }
  0xf4   : > { %1733 = vmatmul.mubr.msk.f32.vlgmr.msra.gmra.mrb[2].mxu0 %vm350_vm5, %v349_v21  ;;  %1740 = vmatpush3.msk.msra.mxu1 %vm344_vm4, %v343_v25 }
  0xf5   : > { %1742 = vmatmul.mubr.msk.f32.vlgmr.msra.gmra.mrb[2].mxu1 %vm350_vm5, %v349_v21  ;;  %1848 = vmatprep.subr.bf16.mxu0 %v2220_v0 }
  0xf6   : > { %1856 = vmatprep.subr.bf16.mxu1 %v2220_v0  ;;  %1754 = vmatprep.mubr.msk.f32.mxu0 %vm2221_vm0, %v2222_v1 }
  0xf7   : > { %1767 = vmatprep.mubr.msk.f32.mxu1 %vm2221_vm0, %v2222_v1 }
 0x1c0   : > { %v420_v26 = vpop.f32.mrb[0].mxu0  ;;  %v490_v27 = vpop.f32.mrb[0].mxu1 }
 0x1c1   : > { %636 = vadd.xlane.f32.xlu1 %v490_v27  ;;  %634 = vadd.xlane.f32.xlu0 %v420_v26  ;;  %v1716_v28 = vpop.f32.mrb[1].mxu0  ;;  %v1725_v29 = vpop.f32.mrb[1].mxu1  ;;  %v646_v30 = vmul.f32 %v420_v26, %v420_v26  ;;  %v647_v31 = vmul.f32 %v490_v27, %v490_v27 }
 0x1c5   : > { %650 = vadd.xlane.f32.xlu0 %v646_v30 }
 0x1c7   : > { %v560_v32 = vpop.f32.mrb[2].mxu0 }
 0x1c8   : > { %638 = vadd.xlane.f32.xlu1 %v560_v32  ;;  %v648_v33 = vmul.f32 %v560_v32, %v560_v32  ;;  %v2526_v34 = vpop.f32.mrb[2].mxu1  ;;  %v1734_v35 = vpop.f32.mrb[3].mxu0 }
 0x1c9   : > { %652 = vadd.xlane.f32.xlu0 %v647_v31  ;;  %v1743_v36 = vpop.f32.mrb[3].mxu1  ;;  %v649_v37 = vmul.f32 %v2526_v34, %v2526_v34 }
 0x1cc   : > { %654 = vadd.xlane.f32.xlu1 %v648_v33 }
 0x1cd   : > { %640 = vadd.xlane.f32.xlu0 %v2526_v34 }
 0x1d1   : > { %656 = vadd.xlane.f32.xlu0 %v649_v37 }
 0x24e   : > { %v635_v38 = vpop.xlane.xlu0 %634  ;;  %v637_v40 = vpop.xlane.xlu1 %636 }
 0x24f   : > { %v642_v39 = vmul.f32 0.0078125, %v635_v38  ;;  %v643_v42 = vmul.f32 0.0078125, %v637_v40 }
 0x251   : > { %v662_v43 = vmul.f32 %v642_v39, %v642_v39  ;;  %v663_v45 = vmul.f32 %v643_v42, %v643_v42  ;;  %v678_v7 = vsub.f32 %v420_v26, %v642_v39  ;;  %v679_v13 = vsub.f32 %v490_v27, %v643_v42 }
 0x252   : > { %v651_v41 = vpop.xlane.xlu0 %650 }
 0x253   : > { %v658_v44 = vmul.f32 0.0078125, %v651_v41 }
 0x255   : > { %v666_v46 = vsub.f32 %v658_v44, %v662_v43  ;;  %v639_v47 = vpop.xlane.xlu1 %638 }
 0x256   : > { %v644_v48 = vmul.f32 0.0078125, %v639_v47  ;;  %v653_v49 = vpop.xlane.xlu0 %652 }
 0x257   : > { %v670_v50 = vadd.f32 1e-05, %v666_v46  ;;  %v659_v51 = vmul.f32 0.0078125, %v653_v49 }
 0x258   : > { %v664_v52 = vmul.f32 %v644_v48, %v644_v48  ;;  %v680_v19 = vsub.f32 %v560_v32, %v644_v48 }
 0x259   : > { %2025 = vrsqrt.f32 %v670_v50  ;;  %v667_v53 = vsub.f32 %v659_v51, %v663_v45  ;;  %v655_v54 = vpop.xlane.xlu1 %654  ;;  %v749_v50 = vld [vmem:[%s2767_s2] sm:$0xff] }
 0x25a   : > { %v660_v55 = vmul.f32 0.0078125, %v655_v54  ;;  %v641_v56 = vpop.xlane.xlu0 %640 }
 0x25b   : > { %v671_v57 = vadd.f32 1e-05, %v667_v53  ;;  %v645_v58 = vmul.f32 0.0078125, %v641_v56 }
 0x25c   : > { %v668_v59 = vsub.f32 %v660_v55, %v664_v52 }
 0x25d   : > { %2027 = vrsqrt.f32 %v671_v57  ;;  %v665_v60 = vmul.f32 %v645_v58, %v645_v58  ;;  %v681_v25 = vsub.f32 %v2526_v34, %v645_v58 }
 0x25e   : > { %v672_v61 = vadd.f32 1e-05, %v668_v59  ;;  %v657_v62 = vpop.xlane.xlu0 %656 }
 0x25f   : > { %v661_v63 = vmul.f32 0.0078125, %v657_v62 }
 0x260   : > { %2029 = vrsqrt.f32 %v672_v61 }
 0x261   : > { %v669_v5 = vsub.f32 %v661_v63, %v665_v60 }
 0x263   : > { %v2026_v8 = vpop.eup %2025  ;;  %v673_v10 = vadd.f32 1e-05, %v669_v5 }
 0x264   : > { %v682_v11 = vmul.f32 %v2026_v8, %v678_v7 }
 0x265   : > { %2031 = vrsqrt.f32 %v673_v10 }
 0x266   : > { %v691_v17 = vmul.f32 %v2531_v12, %v682_v11  ;;  %vm686_vm6 = vcmp.ge.f32.partialorder %v682_v11, 0.0 }
 0x267   : > { %v2028_v15 = vpop.eup %2027 }
 0x268   : > { %v683_v16 = vmul.f32 %v2028_v15, %v679_v13  ;;  %v695_v22 = vsel %vm686_vm6, %v682_v11, %v691_v17 }
 0x26a   : > { %v2030_v18 = vpop.eup %2029  ;;  %vm687_vm7 = vcmp.ge.f32.partialorder %v683_v16, 0.0  ;;  %v692_v20 = vmul.f32 %v2531_v12, %v683_v16 }
 0x26b   : > { %v684_v21 = vmul.f32 %v2030_v18, %v680_v19 }
 0x26c   : > { %v696_v23 = vsel %vm687_vm7, %v683_v16, %v692_v20 }
 0x26d   : > { %v1990_v24 = vpack.i.bf16 %v696_v23, %v695_v22  ;;  %v693_v28 = vmul.f32 %v2531_v12, %v684_v21  ;;  %vm688_vm8 = vcmp.ge.f32.partialorder %v684_v21, 0.0 }
 0x26f   : > { %v2032_v26 = vpop.eup %2031  ;;  %1991 = vrot.lane.b32.xlu0 %v1990_v24, %s2224_s8  ;;  %1986 = vrot.lane.b32.xlu1 %v1990_v24, %s2226_s18  ;;  %v2540_v30 = vsel %vm688_vm8, %v684_v21, %v693_v28 }
 0x270   : > { %v685_v27 = vmul.f32 %v2032_v26, %v681_v25 }
 0x272   : > { %vm689_vm9 = vcmp.ge.f32.partialorder %v685_v27, 0.0  ;;  %v694_v29 = vmul.f32 %v2531_v12, %v685_v27 }
 0x273   : > { %1996 = vrot.lane.b32.xlu1 %v1990_v24, %s2223_s30 }
 0x274   : > { %v698_v31 = vsel %vm689_vm9, %v685_v27, %v694_v29 }
 0x275   : > { %v2005_v32 = vpack.i.bf16 %v698_v31, %v2540_v30 }
 0x277   : > { %2006 = vrot.lane.b32.xlu0 %v2005_v32, %s2224_s8  ;;  %736 = vrot.lane.b32.xlu1 %v695_v22, %s2227_s19 }
 0x27b   : > { %738 = vrot.lane.b32.xlu0 %v696_v23, %s2227_s19  ;;  %2001 = vrot.lane.b32.xlu1 %v2005_v32, %s2226_s18 }
 0x27f   : > { %740 = vrot.lane.b32.xlu0 %v2540_v30, %s2227_s19  ;;  %2011 = vrot.lane.b32.xlu1 %v2005_v32, %s2223_s30 }
 0x283   : > { %742 = vrot.lane.b32.xlu1 %v698_v31, %s2227_s19 }
 0x2e1   : > { %v1992_v33 = vpop.permute.xlu0 %1991  ;;  %v1987_v34 = vpop.permute.xlu1 %1986 }
 0x2e2   : > { %v1994_v35 = vunpack.i.h.bf16 %v1992_v33  ;;  %v1993_v36 = vunpack.i.l.bf16 %v1992_v33  ;;  %v1989_v37 = vunpack.i.h.bf16 %v1987_v34  ;;  %v1988_v38 = vunpack.i.l.bf16 %v1987_v34 }
 0x2e4   : > { %v1857_v40 = vpack.c.bf16 %v1994_v35, %v1989_v37  ;;  %v1849_v41 = vpack.c.bf16 %v1993_v36, %v1988_v38 }
 0x2e5   : > { %v1997_v42 = vpop.permute.xlu1 %1996 }
 0x2e6   : > { %v1999_v43 = vunpack.i.h.bf16 %v1997_v42  ;;  %v1998_v44 = vunpack.i.l.bf16 %v1997_v42  ;;  %1851 = vmatpush3.bf16.msk.msra.mxu0 %vm2549_vm11, %v1849_v41  ;;  %1859 = vmatpush3.bf16.msk.msra.mxu1 %vm2549_vm11, %v1857_v40 }
 0x2e7   : > { %1852 = vmatprep.subr.bf16.mxu0 %v2220_v0  ;;  %1860 = vmatprep.subr.bf16.mxu1 %v2220_v0 }
 0x2e8   : > { %v1861_v46 = vpack.c.bf16 %v1999_v43, %v696_v23  ;;  %v1853_v47 = vpack.c.bf16 %v1998_v44, %v695_v22 }
 0x2e9   : > { %v2007_v48 = vpop.permute.xlu0 %2006  ;;  %v737_v49 = vpop.permute.xlu1 %736 }
 0x2ea   : > { %1855 = vmatpush3.bf16.msk.msra.mxu0 %vm2562_vm12, %v1853_v47  ;;  %1863 = vmatpush3.bf16.msk.msra.mxu1 %vm2562_vm12, %v1861_v46  ;;  %v2009_v53 = vunpack.i.h.bf16 %v2007_v48  ;;  %v2008_v54 = vunpack.i.l.bf16 %v2007_v48 }
 0x2eb   : > { %1752 = vmatprep.subr.mxu0 %v2222_v1  ;;  %1765 = vmatprep.subr.mxu1 %v2222_v1 }
 0x2ed   : > { %v739_v51 = vpop.permute.xlu0 %738  ;;  %v2002_v52 = vpop.permute.xlu1 %2001 }
 0x2ee   : > { %v2004_v55 = vunpack.i.h.bf16 %v2002_v52  ;;  %v2003_v56 = vunpack.i.l.bf16 %v2002_v52  ;;  %1753 = vmatpush3.msk.msra.mxu0 %vm744_vm13, %v737_v49  ;;  %1766 = vmatpush3.msk.msra.mxu1 %vm744_vm13, %v739_v51 }
 0x2ef   : > { %1755 = vmatmul.mubr.msk.f32.vlgmr.msra.gmra.mrb[4].mxu0 %vm750_vm14, %v749_v50  ;;  %1768 = vmatmul.mubr.msk.f32.vlgmr.msra.gmra.mrb[4].mxu1 %vm750_vm14, %v749_v50 }
 0x2f0   : > { %v1873_v57 = vpack.c.bf16 %v2009_v53, %v2004_v55  ;;  %v1865_v58 = vpack.c.bf16 %v2008_v54, %v2003_v56  ;;  %1864 = vmatprep.subr.bf16.mxu0 %v2220_v0  ;;  %1872 = vmatprep.subr.bf16.mxu1 %v2220_v0 }
 0x2f1   : > { %v2012_v59 = vpop.permute.xlu1 %2011  ;;  %1780 = vmatprep.mubr.msk.f32.mxu0 %vm2221_vm0, %v2222_v1  ;;  %1793 = vmatprep.mubr.msk.f32.mxu1 %vm2221_vm0, %v2222_v1  ;;  %v741_v5 = vpop.permute.xlu0 %740 }
 0x2f2   : > { %v2014_v60 = vunpack.i.h.bf16 %v2012_v59  ;;  %v2013_v61 = vunpack.i.l.bf16 %v2012_v59  ;;  %1867 = vmatpush3.bf16.msk.msra.mxu0 %vm2549_vm11, %v1865_v58  ;;  %1875 = vmatpush3.bf16.msk.msra.mxu1 %vm2549_vm11, %v1873_v57 }
 0x2f3   : > { %1868 = vmatprep.subr.bf16.mxu0 %v2220_v0  ;;  %1876 = vmatprep.subr.bf16.mxu1 %v2220_v0 }
 0x2f4   : > { %v1877_v62 = vpack.c.bf16 %v2014_v60, %v698_v31  ;;  %v1869_v63 = vpack.c.bf16 %v2013_v61, %v2540_v30 }
 0x2f5   : > { %v743_v7 = vpop.permute.xlu1 %742 }
 0x2f6   : > { %1871 = vmatpush3.bf16.msk.msra.mxu0 %vm2562_vm12, %v1869_v63  ;;  %1879 = vmatpush3.bf16.msk.msra.mxu1 %vm2562_vm12, %v1877_v62 }
 0x2f7   : > { %1778 = vmatprep.subr.mxu0 %v2222_v1  ;;  %1791 = vmatprep.subr.mxu1 %v2222_v1 }
 0x2fa   : > { %1779 = vmatpush3.msk.msra.mxu0 %vm744_vm13, %v741_v5  ;;  %1792 = vmatpush3.msk.msra.mxu1 %vm744_vm13, %v743_v7 }
 0x2fb   : > { %1781 = vmatmul.mubr.msk.f32.vlgmr.msra.gmra.mrb[6].mxu0 %vm750_vm14, %v749_v50  ;;  %1794 = vmatmul.mubr.msk.f32.vlgmr.msra.gmra.mrb[6].mxu1 %vm750_vm14, %v749_v50 }
 0x2fc   : > { %1880 = vmatprep.subr.bf16.mxu0 %v2220_v0  ;;  %1884 = vmatprep.subr.bf16.mxu1 %v2220_v0 }
 0x2fd   : > { %1802 = vmatprep.mubr.msk.f32.mxu0 %vm2221_vm0, %v2222_v1  ;;  %1811 = vmatprep.mubr.msk.f32.mxu1 %vm2221_vm0, %v2222_v1 }
 0x3c2   : > { %v820_v8 = vpop.f32.mrb[4].mxu0  ;;  %v890_v10 = vpop.f32.mrb[4].mxu1 }
 0x3c3   : > { %1036 = vadd.xlane.f32.xlu1 %v890_v10  ;;  %1034 = vadd.xlane.f32.xlu0 %v820_v8  ;;  %v1756_v11 = vpop.f32.mrb[5].mxu0  ;;  %v1769_v13 = vpop.f32.mrb[5].mxu1  ;;  %v1046_v15 = vmul.f32 %v820_v8, %v820_v8  ;;  %v1047_v16 = vmul.f32 %v890_v10, %v890_v10 }
 0x3c7   : > { %1050 = vadd.xlane.f32.xlu0 %v1046_v15 }
 0x3cb   : > { %1052 = vadd.xlane.f32.xlu0 %v1047_v16 }
 0x3ce   : > { %v960_v17 = vpop.f32.mrb[6].mxu0  ;;  %v1030_v18 = vpop.f32.mrb[6].mxu1 }
 0x3cf   : > { %v1795_v19 = vpop.f32.mrb[7].mxu1  ;;  %1040 = vadd.xlane.f32.xlu0 %v1030_v18  ;;  %1038 = vadd.xlane.f32.xlu1 %v960_v17  ;;  %v1782_v20 = vpop.f32.mrb[7].mxu0  ;;  %v1049_v21 = vmul.f32 %v1030_v18, %v1030_v18  ;;  %v1048_v22 = vmul.f32 %v960_v17, %v960_v17 }
 0x3d0   : > { %v294_v20 = vmul.f32 %v2463_v6, %v2463_v6 }
 0x3d3   : > { %1056 = vadd.xlane.f32.xlu0 %v1049_v21  ;;  %1054 = vadd.xlane.f32.xlu1 %v1048_v22 }
 0x450   : > { %v1035_v23 = vpop.xlane.xlu0 %1034  ;;  %v1037_v25 = vpop.xlane.xlu1 %1036 }
 0x451   : > { %v1042_v24 = vmul.f32 0.0078125, %v1035_v23  ;;  %v1043_v29 = vmul.f32 0.0078125, %v1037_v25 }
 0x453   : > { %v1062_v27 = vmul.f32 %v1042_v24, %v1042_v24  ;;  %v1063_v32 = vmul.f32 %v1043_v29, %v1043_v29  ;;  %v1078_v49 = vsub.f32 %v820_v8, %v1042_v24  ;;  %v1079_v54 = vsub.f32 %v890_v10, %v1043_v29 }
 0x454   : > { %v1051_v26 = vpop.xlane.xlu0 %1050 }
 0x455   : > { %v1058_v28 = vmul.f32 0.0078125, %v1051_v26 }
 0x457   : > { %v1066_v30 = vsub.f32 %v1058_v28, %v1062_v27  ;;  %v1122_v27 = vld [vmem:[#allocation8] sm:$0xff] }
 0x458   : > { %v1053_v31 = vpop.xlane.xlu0 %1052 }
 0x459   : > { %v1070_v33 = vadd.f32 1e-05, %v1066_v30  ;;  %v1059_v34 = vmul.f32 0.0078125, %v1053_v31 }
 0x45b   : > { %2033 = vrsqrt.f32 %v1070_v33  ;;  %v1067_v35 = vsub.f32 %v1059_v34, %v1063_v32 }
 0x45c   : > { %v1041_v36 = vpop.xlane.xlu0 %1040  ;;  %v1039_v37 = vpop.xlane.xlu1 %1038 }
 0x45d   : > { %v1071_v38 = vadd.f32 1e-05, %v1067_v35  ;;  %v1045_v39 = vmul.f32 0.0078125, %v1041_v36  ;;  %v1044_v40 = vmul.f32 0.0078125, %v1039_v37 }
 0x45f   : > { %2035 = vrsqrt.f32 %v1071_v38  ;;  %v1065_v43 = vmul.f32 %v1045_v39, %v1045_v39  ;;  %v1064_v44 = vmul.f32 %v1044_v40, %v1044_v40  ;;  %v1081_v62 = vsub.f32 %v1030_v18, %v1045_v39 }
 0x460   : > { %v1057_v41 = vpop.xlane.xlu0 %1056  ;;  %v1055_v42 = vpop.xlane.xlu1 %1054  ;;  %v1080_v5 = vsub.f32 %v960_v17, %v1044_v40  ;;  %v293_v17 = vmul.f32 %v2457_v4, %v2457_v4  ;;  %v292_v18 = vmul.f32 %v2455_v3, %v2455_v3 }
 0x461   : > { %v1061_v45 = vmul.f32 0.0078125, %v1057_v41  ;;  %v1060_v46 = vmul.f32 0.0078125, %v1055_v42 }
 0x463   : > { %v1069_v47 = vsub.f32 %v1061_v45, %v1065_v43  ;;  %v1068_v48 = vsub.f32 %v1060_v46, %v1064_v44 }
 0x465   : > { %v2034_v50 = vpop.eup %2033  ;;  %v1073_v51 = vadd.f32 1e-05, %v1069_v47  ;;  %v1072_v52 = vadd.f32 1e-05, %v1068_v48 }
 0x466   : > { %v1082_v53 = vmul.f32 %v2034_v50, %v1078_v49 }
 0x467   : > { %2037 = vrsqrt.f32 %v1073_v51 }
 0x468   : > { %2039 = vrsqrt.f32 %v1072_v52  ;;  %v1090_v57 = vmul.f32 %v1082_v53, %v2531_v12  ;;  %vm1086_vm15 = vcmp.ge.f32.partialorder %v1082_v53, 0.0 }
 0x469   : > { %v2036_v55 = vpop.eup %2035 }
 0x46a   : > { %v1083_v56 = vmul.f32 %v2036_v55, %v1079_v54  ;;  %v1094_v59 = vsel %vm1086_vm15, %v1082_v53, %v1090_v57 }
 0x46c   : > { %vm1087_vm1 = vcmp.ge.f32.partialorder %v1083_v56, 0.0  ;;  %v1091_v58 = vmul.f32 %v1083_v56, %v2531_v12 }
 0x46e   : > { %v1095_v60 = vsel %vm1087_vm1, %v1083_v56, %v1091_v58 }
 0x46f   : > { %v2015_v61 = vpack.i.bf16 %v1095_v60, %v1094_v59 }
 0x471   : > { %v2038_v63 = vpop.eup %2037  ;;  %2016 = vrot.lane.b32.xlu1 %v2015_v61, %s2224_s8 }
 0x472   : > { %v2040_v7 = vpop.eup %2039  ;;  %v1085_v8 = vmul.f32 %v2038_v63, %v1081_v62 }
 0x473   : > { %v1084_v10 = vmul.f32 %v2040_v7, %v1080_v5 }
 0x474   : > { %vm1089_vm2 = vcmp.ge.f32.partialorder %v1085_v8, 0.0  ;;  %v1093_v11 = vmul.f32 %v1085_v8, %v2531_v12 }
 0x475   : > { %1110 = vrot.lane.b32.xlu1 %v1094_v59, %s2223_s30  ;;  %vm1088_vm6 = vcmp.ge.f32.partialorder %v1084_v10, 0.0  ;;  %v1092_v13 = vmul.f32 %v1084_v10, %v2531_v12  ;;  %v291_v12 = vmul.f32 %v2453_v2, %v2453_v2 }
 0x476   : > { %v1097_v15 = vsel %vm1089_vm2, %v1085_v8, %v1093_v11 }
 0x477   : > { %v1096_v16 = vsel %vm1088_vm6, %v1084_v10, %v1092_v13 }
 0x478   : > { %v2020_v19 = vpack.i.bf16 %v1097_v15, %v1096_v16 }
 0x479   : > { %1112 = vrot.lane.b32.xlu1 %v1095_v60, %s2223_s30 }
 0x47a   : > { %2021 = vrot.lane.b32.xlu0 %v2020_v19, %s2224_s8 }
 0x47d   : > { %1116 = vrot.lane.b32.xlu1 %v1097_v15, %s2223_s30 }
 0x47e   : > { %1114 = vrot.lane.b32.xlu0 %v1096_v16, %s2223_s30  ;;  %s2149_s30 = scalar_lea.vmem %s2148_s29, 1024 }
 0x47f   : > { %p2151_p0 = scmp.lt.s32.totalorder %s2149_s30, %s2143_s27 }
 0x481   : > { %p2152_p9 = por %p2151_p0, %p2150_p2 }
 0x483   : > { %p2153_p6 = pnand %p2152_p9, %p2146_p10 }
 0x49d   : > { %278 = vadd.xlane.f32.xlu0 %v2453_v2 }
 0x4a1   : > { %280 = vadd.xlane.f32.xlu1 %v2455_v3  ;;  %282 = vadd.xlane.f32.xlu0 %v2457_v4 }
 0x4a5   : > { %295 = vadd.xlane.f32.xlu1 %v291_v12  ;;  %284 = vadd.xlane.f32.xlu0 %v2463_v6 }
 0x4a9   : > { %299 = vadd.xlane.f32.xlu1 %v293_v17  ;;  %297 = vadd.xlane.f32.xlu0 %v292_v18 }
 0x4ad   : > { %301 = vadd.xlane.f32.xlu0 %v294_v20 }
 0x4e3   : > { %v2017_v21 = vpop.permute.xlu1 %2016 }
 0x4e4   : > { %v2019_v22 = vunpack.i.h.bf16 %v2017_v21  ;;  %v2018_v23 = vunpack.i.l.bf16 %v2017_v21 }
 0x4e6   : > { %v1885_v24 = vpack.c.bf16 %v1095_v60, %v2019_v22  ;;  %v1881_v25 = vpack.c.bf16 %v1094_v59, %v2018_v23 }
 0x4e7   : > { %v1111_v26 = vpop.permute.xlu1 %1110 }
 0x4e8   : > { %1883 = vmatpush3.bf16.msk.msra.mxu0 %vm2481_vm3, %v1881_v25  ;;  %1887 = vmatpush3.bf16.msk.msra.mxu1 %vm2481_vm3, %v1885_v24 }
 0x4e9   : > { %1800 = vmatprep.subr.mxu0 %v2222_v1  ;;  %1809 = vmatprep.subr.mxu1 %v2222_v1 }
 0x4eb   : > { %v1113_v28 = vpop.permute.xlu1 %1112 }
 0x4ec   : > { %v2022_v29 = vpop.permute.xlu0 %2021  ;;  %1801 = vmatpush3.msk.msra.mxu0 %vm344_vm4, %v1111_v26  ;;  %1810 = vmatpush3.msk.msra.mxu1 %vm344_vm4, %v1113_v28 }
 0x4ed   : > { %v2024_v30 = vunpack.i.h.bf16 %v2022_v29  ;;  %v2023_v31 = vunpack.i.l.bf16 %v2022_v29  ;;  %1803 = vmatmul.mubr.msk.f32.vlgmr.msra.gmra.mrb[8].mxu0 %vm350_vm5, %v1122_v27  ;;  %1812 = vmatmul.mubr.msk.f32.vlgmr.msra.gmra.mrb[8].mxu1 %vm350_vm5, %v1122_v27 }
 0x4ee   : > { %1888 = vmatprep.subr.bf16.mxu0 %v2220_v0  ;;  %1892 = vmatprep.subr.bf16.mxu1 %v2220_v0 }
 0x4ef   : > { %v1893_v32 = vpack.c.bf16 %v1097_v15, %v2024_v30  ;;  %v1889_v33 = vpack.c.bf16 %v1096_v16, %v2023_v31  ;;  %1820 = vmatprep.mubr.msk.f32.mxu0 %vm2221_vm0, %v2222_v1  ;;  %1829 = vmatprep.mubr.msk.f32.mxu1 %vm2221_vm0, %v2222_v1  ;;  %v1117_v0 = vpop.permute.xlu1 %1116 }
 0x4f0   : > { %v1115_v34 = vpop.permute.xlu0 %1114 }
 0x4f1   : > { %1891 = vmatpush3.bf16.msk.msra.mxu0 %vm2481_vm3, %v1889_v33  ;;  %1895 = vmatpush3.bf16.msk.msra.mxu1 %vm2481_vm3, %v1893_v32 }
 0x4f2   : > { %1818 = vmatprep.subr.mxu0 %v2222_v1  ;;  %1827 = vmatprep.subr.mxu1 %v2222_v1 }
 0x4f5   : > { %1819 = vmatpush3.msk.msra.mxu0 %vm344_vm4, %v1115_v34  ;;  %1828 = vmatpush3.msk.msra.mxu1 %vm344_vm4, %v1117_v0 }
 0x4f6   : > { %1821 = vmatmul.mubr.msk.f32.vlgmr.msra.gmra.mrb[10].mxu0 %vm350_vm5, %v1122_v27  ;;  %1830 = vmatmul.mubr.msk.f32.vlgmr.msra.gmra.mrb[10].mxu1 %vm350_vm5, %v1122_v27 }
 0x52a   : > { %v279_v44 = vpop.xlane.xlu0 %278 }
 0x52b   : > { %v2687_v51 = vmul.f32 0.0078125, %v279_v44 }
 0x52d   : > { %v307_v56 = vmul.f32 %v2687_v51, %v2687_v51 }
 0x52e   : > { %v283_v45 = vpop.xlane.xlu0 %282  ;;  %v281_v46 = vpop.xlane.xlu1 %280 }
 0x52f   : > { %v2685_v50 = vmul.f32 0.0078125, %v281_v46  ;;  %v2695_v7 = vmul.f32 0.0078125, %v283_v45  ;;  %v1462_v46 = vsub.f32 %v2453_v2, %v2687_v51 }
 0x531   : > { %v308_v52 = vmul.f32 %v2685_v50, %v2685_v50  ;;  %v309_v20 = vmul.f32 %v2695_v7, %v2695_v7 }
 0x532   : > { %v285_v47 = vpop.xlane.xlu0 %284  ;;  %v296_v48 = vpop.xlane.xlu1 %295 }
 0x533   : > { %v303_v57 = vmul.f32 0.0078125, %v296_v48  ;;  %v2693_v58 = vmul.f32 0.0078125, %v285_v47 }
 0x535   : > { %v311_v5 = vsub.f32 %v303_v57, %v307_v56  ;;  %v310_v8 = vmul.f32 %v2693_v58, %v2693_v58  ;;  %v1465_v2 = vsub.f32 %v2463_v6, %v2693_v58 }
 0x536   : > { %v298_v49 = vpop.xlane.xlu0 %297  ;;  %v300_v54 = vpop.xlane.xlu1 %299 }
 0x537   : > { %v304_v53 = vmul.f32 0.0078125, %v298_v49  ;;  %v315_v18 = vadd.f32 1e-05, %v311_v5  ;;  %v305_v21 = vmul.f32 0.0078125, %v300_v54 }
 0x539   : > { %v312_v59 = vsub.f32 %v304_v53, %v308_v52  ;;  %v313_v31 = vsub.f32 %v305_v21, %v309_v20 }
 0x53a   : > { %v302_v55 = vpop.xlane.xlu0 %301 }
 0x53b   : > { %v316_v10 = vadd.f32 1e-05, %v312_v59  ;;  %v306_v11 = vmul.f32 0.0078125, %v302_v55 }
 0x53d   : > { %2041 = vrsqrt.f32 %v316_v10  ;;  %v314_v24 = vsub.f32 %v306_v11, %v310_v8 }
 0x53e   : > { %2043 = vrsqrt.f32 %v315_v18 }
 0x53f   : > { %v318_v32 = vadd.f32 1e-05, %v314_v24 }
 0x547   : > { %v2042_v45 = vpop.eup %2041 }
 0x548   : > { %v2044_v47 = vpop.eup %2043 }
 0x5c0   : > { %v2665_v35 = vpop.f32.mrb[8].mxu0  ;;  %v2667_v14 = vpop.f32.mrb[8].mxu1 }
 0x5c1   : > { %1408 = vadd.xlane.f32.xlu0 %v2667_v14  ;;  %v1813_v36 = vpop.f32.mrb[9].mxu1  ;;  %1406 = vadd.xlane.f32.xlu1 %v2665_v35  ;;  %v1804_v1 = vpop.f32.mrb[9].mxu0  ;;  %v1419_v37 = vmul.f32 %v2667_v14, %v2667_v14  ;;  %v1418_v9 = vmul.f32 %v2665_v35, %v2665_v35 }
 0x5c5   : > { %1424 = vadd.xlane.f32.xlu0 %v1419_v37  ;;  %1422 = vadd.xlane.f32.xlu1 %v1418_v9  ;;  %v317_v9 = vadd.f32 1e-05, %v313_v31 }
 0x5c9   : > { %v2675_v38 = vpop.f32.mrb[10].mxu0  ;;  %v2677_v39 = vpop.f32.mrb[10].mxu1 }
 0x5ca   : > { %1412 = vadd.xlane.f32.xlu0 %v2677_v39  ;;  %v1831_v40 = vpop.f32.mrb[11].mxu1  ;;  %1410 = vadd.xlane.f32.xlu1 %v2675_v38  ;;  %v1822_v41 = vpop.f32.mrb[11].mxu0  ;;  %v1421_v42 = vmul.f32 %v2677_v39, %v2677_v39  ;;  %v1420_v43 = vmul.f32 %v2675_v38, %v2675_v38 }
 0x5ce   : > { %1428 = vadd.xlane.f32.xlu0 %v1421_v42  ;;  %1426 = vadd.xlane.f32.xlu1 %v1420_v43  ;;  %v1463_v42 = vsub.f32 %v2455_v3, %v2685_v50  ;;  %v1466_v50 = vmul.f32 %v2044_v47, %v1462_v46 }
 0x5d0   : > { %v1467_v54 = vmul.f32 %v2042_v45, %v1463_v42 }
 0x64e   : > { %v1409_v60 = vpop.xlane.xlu0 %1408  ;;  %v1407_v61 = vpop.xlane.xlu1 %1406 }
 0x64f   : > { %v1415_v62 = vmul.f32 0.0078125, %v1409_v60  ;;  %v1414_v63 = vmul.f32 0.0078125, %v1407_v61  ;;  %v1464_v60 = vsub.f32 %v2457_v4, %v2695_v7 }
 0x651   : > { %v1435_v16 = vmul.f32 %v1415_v62, %v1415_v62  ;;  %v1434_v19 = vmul.f32 %v1414_v63, %v1414_v63  ;;  %v1451_v48 = vsub.f32 %v2667_v14, %v1415_v62  ;;  %v1450_v52 = vsub.f32 %v2665_v35, %v1414_v63 }
 0x652   : > { %v1425_v13 = vpop.xlane.xlu0 %1424  ;;  %v1423_v15 = vpop.xlane.xlu1 %1422 }
 0x653   : > { %v1431_v12 = vmul.f32 0.0078125, %v1425_v13  ;;  %v1430_v17 = vmul.f32 0.0078125, %v1423_v15 }
 0x655   : > { %v1439_v22 = vsub.f32 %v1431_v12, %v1435_v16  ;;  %v1438_v23 = vsub.f32 %v1430_v17, %v1434_v19 }
 0x657   : > { %v1443_v25 = vadd.f32 1e-05, %v1439_v22  ;;  %v1442_v26 = vadd.f32 1e-05, %v1438_v23  ;;  %v1413_v27 = vpop.xlane.xlu0 %1412  ;;  %v1411_v28 = vpop.xlane.xlu1 %1410 }
 0x658   : > { %v1417_v29 = vmul.f32 0.0078125, %v1413_v27  ;;  %v1416_v30 = vmul.f32 0.0078125, %v1411_v28 }
 0x659   : > { %2045 = vrsqrt.f32 %v1443_v25 }
 0x65a   : > { %2047 = vrsqrt.f32 %v1442_v26  ;;  %v1437_v0 = vmul.f32 %v1417_v29, %v1417_v29  ;;  %v1436_v36 = vmul.f32 %v1416_v30, %v1416_v30  ;;  %v1453_v61 = vsub.f32 %v2677_v39, %v1417_v29 }
 0x65b   : > { %v1429_v33 = vpop.xlane.xlu0 %1428  ;;  %v1427_v34 = vpop.xlane.xlu1 %1426  ;;  %2049 = vrsqrt.f32 %v318_v32  ;;  %v1452_v63 = vsub.f32 %v2675_v38, %v1416_v30 }
 0x65c   : > { %v1433_v1 = vmul.f32 0.0078125, %v1429_v33  ;;  %v1432_v37 = vmul.f32 0.0078125, %v1427_v34  ;;  %2051 = vrsqrt.f32 %v317_v9 }
 0x65e   : > { %v1441_v40 = vsub.f32 %v1433_v1, %v1437_v0  ;;  %v1440_v41 = vsub.f32 %v1432_v37, %v1436_v36 }
 0x660   : > { %v1445_v43 = vadd.f32 1e-05, %v1441_v40  ;;  %v1444_v44 = vadd.f32 1e-05, %v1440_v41 }
 0x662   : > { %2053 = vrsqrt.f32 %v1445_v43 }
 0x663   : > { %v2046_v49 = vpop.eup %2045  ;;  %2055 = vrsqrt.f32 %v1444_v44 }
 0x664   : > { %v2048_v53 = vpop.eup %2047  ;;  %v1455_v3 = vmul.f32 %v2046_v49, %v1451_v48 }
 0x665   : > { %v1454_v55 = vmul.f32 %v2048_v53, %v1450_v52  ;;  %v2050_v14 = vpop.eup %2049 }
 0x666   : > { %v1471_v56 = vadd.f32 %v1467_v54, %v1455_v3  ;;  %v2052_v35 = vpop.eup %2051  ;;  %v1469_v8 = vmul.f32 %v2050_v14, %v1465_v2 }
 0x667   : > { %v1470_v57 = vadd.f32 %v1466_v50, %v1454_v55  ;;  %v1468_v58 = vmul.f32 %v2052_v35, %v1464_v60 }
 0x668   : > { %v1475_v59 = vmax.f32 %v1471_v56, 0.0 }
 0x669   : > { %v1474_v51 = vmax.f32 %v1470_v57, 0.0 }
 0x66a   : > { %1479 = vst [vmem:[%s268_s13 + $0x8] sm:$0xff] %v1475_v59 }
 0x66b   : > { %1478 = vst [vmem:[%s268_s13] sm:$0xff] %v1474_v51 }
 0x66c   : > { %v2054_v62 = vpop.eup %2053 }
 0x66d   : > { %v2056_v5 = vpop.eup %2055  ;;  %v1457_v6 = vmul.f32 %v2054_v62, %v1453_v61 }
 0x66e   : > { %v1456_v10 = vmul.f32 %v2056_v5, %v1452_v63 }
 0x66f   : > { %v1473_v4 = vadd.f32 %v1469_v8, %v1457_v6 }
 0x670   : > { %v1472_v7 = vadd.f32 %v1468_v58, %v1456_v10 }
 0x671   : > { %v1477_v11 = vmax.f32 %v1473_v4, 0.0 }
 0x672   : > { %v1476_v38 = vmax.f32 %v1472_v7, 0.0 }
 0x673   : > { %1481 = vst [vmem:[%s268_s13 + $0x18] sm:$0xff] %v1477_v11 }
 0x674   : > { %1480 = vst [vmem:[%s268_s13 + $0x10] sm:$0xff] %v1476_v38 }
 0x675   : > { %2156 = shalt.err (!%p2153_p6)
}
 0x676   : > { %s2157_s8 = scalar_lea.hbm %s2719_s26, 512  ;;  %s2161_s19 = scalar_lea.hbm %s2770_s5, 1024 }
 0x677   : > { %p2158_p12 = scmp.ne.s32.totalorder %s2719_s26, %s2157_s8  ;;  %p2162_p11 = scmp.lt.u32.totalorder %s2719_s26, %s2770_s5 }
 0x678   : > { %p2163_p7 = scmp.lt.u32.totalorder %s2161_s19, %s2157_s8  ;;  %p2165_p8 = scmp.lt.u32.totalorder %s2157_s8, %s2719_s26 }
 0x679   : > { %p2159_p13 = pnand %p2158_p12, %p2795_p4 }
 0x67a   : > { %p2164_p3 = por %p2163_p7, %p2162_p11 }
 0x67b   : > { %p2160_p1 = pneg %p2159_p13 }
 0x67c   : > { %p2166_p5 = por %p2165_p8, %p2164_p3 }
 0x67e   : > { %p2167_p10 = pnand %p2166_p5, %p2160_p1 }
 0x680   : > { %2170 = shalt.err (!%p2167_p10)
}
 0x681   : > { %s2229_s13 = smov 128   ;;  %s2230_s9 = smov 8  }
 0x682   : > { %1906 = dma.vmem_to_hbm [thread:$0]  (%p2795_p4), %s2721_s16, 512, %s2719_s26, %s1483_s10, %s2229_s13, %s2229_s13, %s2230_s9  }
 0x683 PF: > { %s1511_s17 = sand.u32 1, %s2201_s20   ;;  %p2796_p2 = scmp.ne.s32.totalorder %s2779_s7, 0 }
 0x684   : > { %p2797_p0 = scmp.ge.s32.totalorder %s2213_s23, 2  ;;  %s1512_s11 = scalar_lea.sflag [#allocation5], %s1511_s17 }
 0x686   : > { %p1920_p9 = pnand %p2797_p0, %p2796_p2 }
 0x688   : > { %2196 = dma.done.wait (!%p1920_p9), %s1512_s11, 512  }
 0x689   : > { %2198 = vsyncadd (!%p1920_p9), %s1512_s11, 4294966784  ;;  %p20_p6 = scmp.ge.s32.totalorder %s2289_s25, 4   ;;  %s2798_s20 = smov %s2205_s21 }
 0x68a   : > { %s2799_s21 = smov %s2209_s22  ;;  %s2800_s22 = smov %s2301_s28 }
 0x68b   : > { %s2801_s23 = smov %s2289_s25  ;;  %22 = sbr.rel (!%p20_p6) target bundleno = 8 (0x8), region = 93 }
 0x692   :  { %1517 = vsyncpa [#allocation4], 1 }
 0x693   :  { %1519 = vsyncpa [#allocation4 + $0x1], 1 }
 0x694   :  { %1520 = vsyncpa [#allocation7], 1 }
 0x695   :  { %1521 = vsyncpa [#allocation5], 1 }
 0x696   :  { %1523 = vsyncpa [#allocation5 + $0x1], 1 }

</bundles_post_ra>
